<compile_context>
chip_gen: v5e
topology: v5e:2x2
jax: 0.10.0
libtpu: 0.0.40
codegen_flags: <defaults>
</compile_context>

<pallas_src>
import jax
import jax.numpy as jnp
from jax.experimental import pallas as pl
from jax.experimental.pallas import tpu as pltpu


def _leaky_relu(v, slope=0.2):
    return jnp.where(v > 0, v, slope * v)


def _round_up(n, m):
    return ((n + m - 1) // m) * m


def deep_phase_kernel(x_ref, w1_ref, w2_ref, w34_ref, w5_ref,
                      b1_ref, b2_ref, b34_ref, b5_ref, out_ref):
    x = x_ref[...]                              # (TILE_B, input_dim), compute dtype
    cdt = x.dtype                               # bf16 (default) or f32

    # Linear(132->256) + LeakyReLU(0.2)   [f32 accumulation, f32 elementwise]
    h = jnp.dot(x, w1_ref[...], preferred_element_type=jnp.float32) + b1_ref[...]
    h = _leaky_relu(h).astype(cdt)

    # Linear(256->128) + LeakyReLU(0.2)
    h = jnp.dot(h, w2_ref[...], preferred_element_type=jnp.float32) + b2_ref[...]
    h = _leaky_relu(h).astype(cdt)

    # Folded Linear(128->32) o Linear(32->16), then LeakyReLU(0.2)
    p = jnp.dot(h, w34_ref[...], preferred_element_type=jnp.float32) + b34_ref[...]
    p = _leaky_relu(p).astype(cdt)

    # Linear(16->2)
    phase = jnp.dot(p, w5_ref[...], preferred_element_type=jnp.float32) + b5_ref[...]

    out_ref[...] = phase.astype(out_ref.dtype)


def prepare_params(params, compute_dtype=jnp.bfloat16):
    """Fold layer3/layer4 (no activation between them); cast weights to compute dtype."""
    (w1, b1), (w2, b2), (w3, b3), (w4, b4), (w5, b5) = params
    w34 = jnp.dot(w3, w4, preferred_element_type=jnp.float32)       # (128, 16)
    b34 = jnp.dot(b3, w4, preferred_element_type=jnp.float32) + b4  # (1, 16)
    ws = tuple(w.astype(compute_dtype) for w in (w1, w2, w34, w5))
    bs = tuple(b.astype(jnp.float32) for b in (b1, b2, b34, b5))    # biases stay f32
    return ws, bs


def deep_phase_forward(x, params, tile_b=2048, compute_dtype=jnp.bfloat16,
                       vmem_limit_bytes=32 * 1024 * 1024):
    """x: (B, input_dim) float32. params: list of 5 (W, b) with W (in,out), b (1,out)."""
    B, in_dim = x.shape
    (w1, w2, w34, w5), (b1, b2, b34, b5) = prepare_params(params, compute_dtype)
    phase_dim = w5.shape[1]

    # Batch tile: multiple of 8 (sublane), capped by tile_b, and no larger than
    # ceil(B/2) rounded up so batches bigger than one tile always give >= 2 grid
    # steps (lets ("parallel",) shard across v7x's two TensorCores).
    tb = max(8, min(int(tile_b), _round_up(pl.cdiv(B, 2), 8)))
    b_pad = _round_up(B, tb)

    x = x.astype(compute_dtype)
    if b_pad != B:
        x = jnp.pad(x, ((0, b_pad - B), (0, 0)))

    grid = (b_pad // tb,)
    resident = lambda i: (0, 0)   # weights/biases loaded once, reused every tile

    out = pl.pallas_call(
        deep_phase_kernel,
        out_shape=jax.ShapeDtypeStruct((b_pad, phase_dim), jnp.float32),
        grid=grid,
        in_specs=[
            pl.BlockSpec((tb, in_dim), lambda i: (i, 0)),   # x: batch-tiled
            pl.BlockSpec(w1.shape, resident),               # (132, 256)
            pl.BlockSpec(w2.shape, resident),               # (256, 128)
            pl.BlockSpec(w34.shape, resident),              # (128, 16)
            pl.BlockSpec(w5.shape, resident),               # (16, 2)
            pl.BlockSpec(b1.shape, resident),                # (1, 256)
            pl.BlockSpec(b2.shape, resident),                # (1, 128)
            pl.BlockSpec(b34.shape, resident),               # (1, 16)
            pl.BlockSpec(b5.shape, resident),                # (1, 2)
        ],
        out_specs=pl.BlockSpec((tb, phase_dim), lambda i: (i, 0)),
        compiler_params=pltpu.CompilerParams(
            dimension_semantics=("parallel",),
            vmem_limit_bytes=vmem_limit_bytes,
        ),
    )(x, w1, w2, w34, w5, b1, b2, b34, b5)

    return out[:B]


def init_params(key, input_dim=132, latent_dim=32, phase_dim=2):
    """Deterministic synthetic initialization (Kaiming-ish uniform like PyTorch)."""
    dims = [(input_dim, 256), (256, 128), (128, latent_dim),
            (latent_dim, 16), (16, phase_dim)]
    params = []
    for (fan_in, fan_out) in dims:
        key, kw, kb = jax.random.split(key, 3)
        bound = 1.0 / jnp.sqrt(jnp.float32(fan_in))
        w = jax.random.uniform(kw, (fan_in, fan_out), jnp.float32, -bound, bound)
        b = jax.random.uniform(kb, (1, fan_out), jnp.float32, -bound, bound)
        params.append((w, b))
    return params


def reference_forward(x, params):
    """Pure-JAX f32 reference (unfolded, matches the PyTorch module)."""
    def leaky(v):
        return jnp.where(v > 0, v, 0.2 * v)
    (w1, b1), (w2, b2), (w3, b3), (w4, b4), (w5, b5) = params
    h = leaky(x @ w1 + b1)
    h = leaky(h @ w2 + b2)
    latent = h @ w3 + b3
    p = leaky(latent @ w4 + b4)
    return p @ w5 + b5


if __name__ == "__main__":
    key = jax.random.PRNGKey(0)
    key, kx, kx2 = jax.random.split(key, 3)

    input_dim, latent_dim, phase_dim = 132, 32, 2
    params = init_params(key, input_dim, latent_dim, phase_dim)

    # Small batch, single grid step, exact-f32 compute path: tight semantics check.
    batch = 8
    x = jax.random.normal(kx, (batch, input_dim), jnp.float32)
    ref = reference_forward(x, params)
    out_f32 = jax.block_until_ready(
        deep_phase_forward(x, params, compute_dtype=jnp.float32))
    assert out_f32.shape == (batch, phase_dim), out_f32.shape
    assert jnp.allclose(out_f32, ref, atol=2e-4, rtol=2e-4), "f32 mismatch vs reference"

    # Default (bf16 weights/inputs, f32 accumulation) path; bf16 rounding -> looser tol.
    out_bf16 = jax.block_until_ready(deep_phase_forward(x, params))
    assert out_bf16.shape == (batch, phase_dim), out_bf16.shape
    assert jnp.allclose(out_bf16, ref, atol=3e-2, rtol=3e-2), "bf16 mismatch vs reference"

    # Non-multiple batch -> padding + 2 grid steps (megacore path), default bf16.
    batch2 = 260
    x2 = jax.random.normal(kx2, (batch2, input_dim), jnp.float32)
    out2 = jax.block_until_ready(deep_phase_forward(x2, params))
    ref2 = reference_forward(x2, params)
    assert out2.shape == (batch2, phase_dim), out2.shape
    assert jnp.allclose(out2, ref2, atol=3e-2, rtol=3e-2), "bf16 mismatch (B=260)"

    print("KERNEL_OK")
</pallas_src>

<mosaic_0001>
module attributes {stable_mosaic.version = 11 : i64} {
  func.func @deep_phase_kernel(%arg0: i32, %arg1: memref<8x132xf32, #tpu.memory_space<vmem>>, %arg2: memref<132x256xf32, #tpu.memory_space<vmem>>, %arg3: memref<256x128xf32, #tpu.memory_space<vmem>>, %arg4: memref<128x16xf32, #tpu.memory_space<vmem>>, %arg5: memref<16x2xf32, #tpu.memory_space<vmem>>, %arg6: memref<1x256xf32, #tpu.memory_space<vmem>>, %arg7: memref<1x128xf32, #tpu.memory_space<vmem>>, %arg8: memref<1x16xf32, #tpu.memory_space<vmem>>, %arg9: memref<1x2xf32, #tpu.memory_space<vmem>>, %arg10: memref<8x2xf32, #tpu.memory_space<vmem>>) attributes {dimension_semantics = [#tpu.dimension_semantics<parallel>], iteration_bounds = array<i64: 1>, scalar_prefetch = 0 : i64, scratch_operands = 0 : i64, tpu.core_type = #tpu.core_type<tc>, window_params = [{transform_indices = @transform_0, window_bounds = array<i64: 8, 132>}, {pipeline_mode = #tpu.pipeline_mode<synchronous>, transform_indices = @transform_1, window_bounds = array<i64: 132, 256>}, {pipeline_mode = #tpu.pipeline_mode<synchronous>, transform_indices = @transform_2, window_bounds = array<i64: 256, 128>}, {pipeline_mode = #tpu.pipeline_mode<synchronous>, transform_indices = @transform_3, window_bounds = array<i64: 128, 16>}, {pipeline_mode = #tpu.pipeline_mode<synchronous>, transform_indices = @transform_4, window_bounds = array<i64: 16, 2>}, {pipeline_mode = #tpu.pipeline_mode<synchronous>, transform_indices = @transform_5, window_bounds = array<i64: 1, 256>}, {pipeline_mode = #tpu.pipeline_mode<synchronous>, transform_indices = @transform_6, window_bounds = array<i64: 1, 128>}, {pipeline_mode = #tpu.pipeline_mode<synchronous>, transform_indices = @transform_7, window_bounds = array<i64: 1, 16>}, {pipeline_mode = #tpu.pipeline_mode<synchronous>, transform_indices = @transform_8, window_bounds = array<i64: 1, 2>}, {transform_indices = @transform_9, window_bounds = array<i64: 8, 2>}]} {
    %c0 = arith.constant 0 : index
    %c0_0 = arith.constant 0 : index
    %0 = vector.load %arg1[%c0, %c0_0] : memref<8x132xf32, #tpu.memory_space<vmem>>, vector<8x132xf32>
    %c0_1 = arith.constant 0 : index
    %c0_2 = arith.constant 0 : index
    %1 = vector.load %arg2[%c0_1, %c0_2] : memref<132x256xf32, #tpu.memory_space<vmem>>, vector<132x256xf32>
    %cst = arith.constant dense<0.000000e+00> : vector<8x256xf32>
    %2 = tpu.matmul %0, %1, %cst {dimension_numbers = #tpu.dot_dimension_numbers<[1], [0], [0], [1], [0, 0, 1, 1], [], []>} : vector<8x132xf32>, vector<132x256xf32>, vector<8x256xf32> -> vector<8x256xf32>
    %c0_3 = arith.constant 0 : index
    %c0_4 = arith.constant 0 : index
    %3 = vector.load %arg6[%c0_3, %c0_4] : memref<1x256xf32, #tpu.memory_space<vmem>>, vector<1x256xf32>
    %4 = vector.broadcast %3 : vector<1x256xf32> to vector<8x256xf32>
    %5 = arith.addf %2, %4 : vector<8x256xf32>
    %cst_5 = arith.constant 0.000000e+00 : f32
    %6 = vector.broadcast %cst_5 : f32 to vector<8x256xf32>
    %7 = arith.cmpf ogt, %5, %6 : vector<8x256xf32>
    %cst_6 = arith.constant 2.000000e-01 : f32
    %8 = vector.broadcast %cst_6 : f32 to vector<8x256xf32>
    %9 = arith.mulf %8, %5 : vector<8x256xf32>
    %10 = arith.select %7, %5, %9 : vector<8x256xi1>, vector<8x256xf32>
    %c0_7 = arith.constant 0 : index
    %c0_8 = arith.constant 0 : index
    %11 = vector.load %arg3[%c0_7, %c0_8] : memref<256x128xf32, #tpu.memory_space<vmem>>, vector<256x128xf32>
    %cst_9 = arith.constant dense<0.000000e+00> : vector<8x128xf32>
    %12 = tpu.matmul %10, %11, %cst_9 {dimension_numbers = #tpu.dot_dimension_numbers<[1], [0], [0], [1], [0, 0, 1, 1], [], []>} : vector<8x256xf32>, vector<256x128xf32>, vector<8x128xf32> -> vector<8x128xf32>
    %c0_10 = arith.constant 0 : index
    %c0_11 = arith.constant 0 : index
    %13 = vector.load %arg7[%c0_10, %c0_11] : memref<1x128xf32, #tpu.memory_space<vmem>>, vector<1x128xf32>
    %14 = vector.broadcast %13 : vector<1x128xf32> to vector<8x128xf32>
    %15 = arith.addf %12, %14 : vector<8x128xf32>
    %cst_12 = arith.constant 0.000000e+00 : f32
    %16 = vector.broadcast %cst_12 : f32 to vector<8x128xf32>
    %17 = arith.cmpf ogt, %15, %16 : vector<8x128xf32>
    %cst_13 = arith.constant 2.000000e-01 : f32
    %18 = vector.broadcast %cst_13 : f32 to vector<8x128xf32>
    %19 = arith.mulf %18, %15 : vector<8x128xf32>
    %20 = arith.select %17, %15, %19 : vector<8x128xi1>, vector<8x128xf32>
    %c0_14 = arith.constant 0 : index
    %c0_15 = arith.constant 0 : index
    %21 = vector.load %arg4[%c0_14, %c0_15] : memref<128x16xf32, #tpu.memory_space<vmem>>, vector<128x16xf32>
    %cst_16 = arith.constant dense<0.000000e+00> : vector<8x16xf32>
    %22 = tpu.matmul %20, %21, %cst_16 {dimension_numbers = #tpu.dot_dimension_numbers<[1], [0], [0], [1], [0, 0, 1, 1], [], []>} : vector<8x128xf32>, vector<128x16xf32>, vector<8x16xf32> -> vector<8x16xf32>
    %c0_17 = arith.constant 0 : index
    %c0_18 = arith.constant 0 : index
    %23 = vector.load %arg8[%c0_17, %c0_18] : memref<1x16xf32, #tpu.memory_space<vmem>>, vector<1x16xf32>
    %24 = vector.broadcast %23 : vector<1x16xf32> to vector<8x16xf32>
    %25 = arith.addf %22, %24 : vector<8x16xf32>
    %cst_19 = arith.constant 0.000000e+00 : f32
    %26 = vector.broadcast %cst_19 : f32 to vector<8x16xf32>
    %27 = arith.cmpf ogt, %25, %26 : vector<8x16xf32>
    %cst_20 = arith.constant 2.000000e-01 : f32
    %28 = vector.broadcast %cst_20 : f32 to vector<8x16xf32>
    %29 = arith.mulf %28, %25 : vector<8x16xf32>
    %30 = arith.select %27, %25, %29 : vector<8x16xi1>, vector<8x16xf32>
    %c0_21 = arith.constant 0 : index
    %c0_22 = arith.constant 0 : index
    %31 = vector.load %arg5[%c0_21, %c0_22] : memref<16x2xf32, #tpu.memory_space<vmem>>, vector<16x2xf32>
    %cst_23 = arith.constant dense<0.000000e+00> : vector<8x2xf32>
    %32 = tpu.matmul %30, %31, %cst_23 {dimension_numbers = #tpu.dot_dimension_numbers<[1], [0], [0], [1], [0, 0, 1, 1], [], []>} : vector<8x16xf32>, vector<16x2xf32>, vector<8x2xf32> -> vector<8x2xf32>
    %c0_24 = arith.constant 0 : index
    %c0_25 = arith.constant 0 : index
    %33 = vector.load %arg9[%c0_24, %c0_25] : memref<1x2xf32, #tpu.memory_space<vmem>>, vector<1x2xf32>
    %34 = vector.broadcast %33 : vector<1x2xf32> to vector<8x2xf32>
    %35 = arith.addf %32, %34 : vector<8x2xf32>
    %c0_26 = arith.constant 0 : index
    %c0_27 = arith.constant 0 : index
    %36 = vector.load %arg10[%c0_26, %c0_27] : memref<8x2xf32, #tpu.memory_space<vmem>>, vector<8x2xf32>
    tpu.vector_store %arg10[%c0_26, %c0_27], %35 {strides = array<i32>} : memref<8x2xf32, #tpu.memory_space<vmem>>, vector<8x2xf32>,
    return
  }
  func.func @transform_0(%arg0: i32) -> (i32, i32) {
    %c0_i32 = arith.constant 0 : i32
    %c0_i32_0 = arith.constant 0 : i32
    return %arg0, %c0_i32 : i32, i32
  }
  func.func @transform_1(%arg0: i32) -> (i32, i32) {
    %c0_i32 = arith.constant 0 : i32
    %c0_i32_0 = arith.constant 0 : i32
    %c0_i32_1 = arith.constant 0 : i32
    return %c0_i32, %c0_i32_0 : i32, i32
  }
  func.func @transform_2(%arg0: i32) -> (i32, i32) {
    %c0_i32 = arith.constant 0 : i32
    %c0_i32_0 = arith.constant 0 : i32
    %c0_i32_1 = arith.constant 0 : i32
    return %c0_i32, %c0_i32_0 : i32, i32
  }
  func.func @transform_3(%arg0: i32) -> (i32, i32) {
    %c0_i32 = arith.constant 0 : i32
    %c0_i32_0 = arith.constant 0 : i32
    %c0_i32_1 = arith.constant 0 : i32
    return %c0_i32, %c0_i32_0 : i32, i32
  }
  func.func @transform_4(%arg0: i32) -> (i32, i32) {
    %c0_i32 = arith.constant 0 : i32
    %c0_i32_0 = arith.constant 0 : i32
    %c0_i32_1 = arith.constant 0 : i32
    return %c0_i32, %c0_i32_0 : i32, i32
  }
  func.func @transform_5(%arg0: i32) -> (i32, i32) {
    %c0_i32 = arith.constant 0 : i32
    %c0_i32_0 = arith.constant 0 : i32
    %c0_i32_1 = arith.constant 0 : i32
    return %c0_i32, %c0_i32_0 : i32, i32
  }
  func.func @transform_6(%arg0: i32) -> (i32, i32) {
    %c0_i32 = arith.constant 0 : i32
    %c0_i32_0 = arith.constant 0 : i32
    %c0_i32_1 = arith.constant 0 : i32
    return %c0_i32, %c0_i32_0 : i32, i32
  }
  func.func @transform_7(%arg0: i32) -> (i32, i32) {
    %c0_i32 = arith.constant 0 : i32
    %c0_i32_0 = arith.constant 0 : i32
    %c0_i32_1 = arith.constant 0 : i32
    return %c0_i32, %c0_i32_0 : i32, i32
  }
  func.func @transform_8(%arg0: i32) -> (i32, i32) {
    %c0_i32 = arith.constant 0 : i32
    %c0_i32_0 = arith.constant 0 : i32
    %c0_i32_1 = arith.constant 0 : i32
    return %c0_i32, %c0_i32_0 : i32, i32
  }
  func.func @transform_9(%arg0: i32) -> (i32, i32) {
    %c0_i32 = arith.constant 0 : i32
    %c0_i32_0 = arith.constant 0 : i32
    return %arg0, %c0_i32 : i32, i32
  }
}

</mosaic_0001>

<bundles_post_ra>
// kernel: tpu_custom_call.1
= control target key start
LH: loop header
LB: loop body
LE: loop exit
PB: predicated region body
PF: predicated region fallthrough
CT: control target
= control target key end

     0   :  { %14 = vsyncpa [#allocation3], 0  ;;  %s570_s0 = inlined_call_operand.vmem [shape: f32[8,132], index: 0, kind: input, shape index: {}]   ;;  %s571_s1 = inlined_call_operand.hbm [shape: f32[132,256], index: 1, kind: input, shape index: {}]   ;;  %s572_s2 = inlined_call_operand.hbm [shape: f32[256,128], index: 2, kind: input, shape index: {}]   ;;  %s573_s3 = inlined_call_operand.vmem [shape: f32[128,16], index: 3, kind: input, shape index: {}]   ;;  %s574_s4 = inlined_call_operand.vmem [shape: f32[16,2], index: 4, kind: input, shape index: {}]   ;;  %s575_s5 = inlined_call_operand.vmem [shape: f32[1,256], index: 5, kind: input, shape index: {}]   ;;  %s576_s6 = inlined_call_operand.vmem [shape: f32[1,128], index: 6, kind: input, shape index: {}]   ;;  %s577_s7 = inlined_call_operand.vmem [shape: f32[1,16], index: 7, kind: input, shape index: {}]   ;;  %s578_s8 = inlined_call_operand.vmem [shape: f32[1,2], index: 8, kind: input, shape index: {}]   ;;  %s579_s9 = inlined_call_operand.vmem [shape: f32[8,2], index: 9, kind: output, shape index: {}]  }
   0x1   :  { %s22_s11 = sshll.u32 %s571_s1, 4  ;;  %s23_s11 = int_to_ptr.hbm [resolvable:$true] %s22_s11 }
   0x2   :  { %15 = vsyncpa [#allocation5], 0  ;;  %s429_s12 = smov [#allocation2]   ;;  %s35_s16 = sshll.u32 %s572_s2, 4  ;;  %s36_s16 = int_to_ptr.hbm [resolvable:$true] %s35_s16 }
   0x3   :  { %s24_s13 = sshll.u32 %s429_s12, 4  ;;  %s430_s17 = smov 256   ;;  %s25_s13 = int_to_ptr.vmem [resolvable:$true] %s24_s13 }
   0x4   :  { %s431_s18 = smov 16   ;;  %s432_s19 = smov [#allocation4]  }
   0x5   :  { %30 = dma.hbm_to_vmem [thread:$0]  %s23_s11, 4352, %s25_s13, [#allocation3], %s430_s17, %s430_s17, %s431_s18  }
   0x6   :  { %s37_s20 = sshll.u32 %s432_s19, 4  ;;  %s433_s21 = smov 128   ;;  %s38_s20 = int_to_ptr.vmem [resolvable:$true] %s37_s20 }
   0x7   :  { %s434_s22 = smov 8  }
   0x8   :  { %43 = dma.hbm_to_vmem [thread:$0]  %s36_s16, 4096, %s38_s20, [#allocation5], %s433_s21, %s433_s21, %s434_s22  }
   0x9   :  { %425 = dma.done.wait [#allocation3], 4352  }
   0xa   :  { %426 = vsyncadd [#allocation3], 4294962944 }
   0xb   :  { %427 = dma.done.wait [#allocation5], 4096  }
   0xc   :  { %428 = vsyncadd [#allocation5], 4294963200  ;;  %v97_v0 = vld [vmem:[#allocation2 + $0xf8] sm:$0xff]  ;;  %v95_v1 = vld [vmem:[#allocation2 + $0xe8] sm:$0xff]  ;;  %vm110_vm0 = vcmask 1043456   ;;  %vm106_vm1 = vcmask 31744  }
   0xd   :  { %157 = vmatpush.msra.mxu2 %v97_v0  ;;  %v96_v2 = vld [vmem:[#allocation2 + $0xf0] sm:$0xff]  ;;  %v93_v3 = vld [vmem:[#allocation2 + $0xd8] sm:$0xff]  ;;  %v94_v4 = vld [vmem:[#allocation2 + $0xe0] sm:$0xff]  ;;  %vm331_vm6 = vcmask 130048   ;;  %vm355_vm7 = vcmask 15360  }
   0xe   :  { %117 = vmatpush.msra.mxu0 %v96_v2  ;;  %v92_v5 = vld [vmem:[#allocation2 + $0xd0] sm:$0xff]  ;;  %v91_v6 = vld [vmem:[#allocation2 + $0xc8] sm:$0xff]  ;;  %v90_v7 = vld [vmem:[#allocation2 + $0xc0] sm:$0xff] }
   0xf   :  { %158 = vmatpush.msra.mxu2 %v95_v1  ;;  %v89_v8 = vld [vmem:[#allocation2 + $0xb8] sm:$0xff]  ;;  %v88_v9 = vld [vmem:[#allocation2 + $0xb0] sm:$0xff]  ;;  %v87_v10 = vld [vmem:[#allocation2 + $0xa8] sm:$0xff] }
  0x10   :  { %118 = vmatpush.msra.mxu0 %v94_v4  ;;  %v86_v11 = vld [vmem:[#allocation2 + $0xa0] sm:$0xff]  ;;  %v85_v12 = vld [vmem:[#allocation2 + $0x98] sm:$0xff]  ;;  %v99_v13 = vld [vmem:[#allocation2 + $0x108] sm:$0xf] }
  0x11   :  { %159 = vmatpush.msra.mxu2 %v93_v3  ;;  %v65_v14 = vld [vmem:[%s570_s0 + $0x8] sm:$0xff]  ;;  %v84_v15 = vld [vmem:[#allocation2 + $0x90] sm:$0xff]  ;;  %365 = vmatpush.msk.msra.mxu3 %vm110_vm0, %v99_v13  ;;  %v98_v16 = vld [vmem:[#allocation2 + $0x100] sm:$0xf] }
  0x12   :  { %119 = vmatpush.msra.mxu0 %v92_v5  ;;  %v83_v17 = vld [vmem:[#allocation2 + $0x88] sm:$0xff]  ;;  %366 = vmatmul.msk.f32.vlgmr.msra.gmra.mxu3 %vm106_vm1, %v65_v14  ;;  %v82_v19 = vld [vmem:[#allocation2 + $0x80] sm:$0xff]  ;;  %v81_v21 = vld [vmem:[#allocation2 + $0x78] sm:$0xff] }
  0x13   :  { %160 = vmatpush.msra.mxu2 %v91_v6  ;;  %v234_v18 = vld [vmem:[#allocation4 + $0xf8] sm:$0xff]  ;;  %363 = vmatpush.msk.msra.mxu1 %vm110_vm0, %v98_v16  ;;  %v233_v22 = vld [vmem:[#allocation4 + $0xf0] sm:$0xff]  ;;  %v80_v23 = vld [vmem:[#allocation2 + $0x70] sm:$0xff] }
  0x14   :  { %120 = vmatpush.msra.mxu0 %v90_v7  ;;  %v218_v20 = vld [vmem:[#allocation4 + $0x78] sm:$0xff]  ;;  %364 = vmatmul.msk.f32.vlgmr.msra.gmra.mxu1 %vm106_vm1, %v65_v14  ;;  %v217_v24 = vld [vmem:[#allocation4 + $0x70] sm:$0xff]  ;;  %v232_v26 = vld [vmem:[#allocation4 + $0xe8] sm:$0xff] }
  0x15   :  { %161 = vmatpush.msra.mxu2 %v89_v8  ;;  %259 = vmatpush.msrb.mxu3 %v234_v18  ;;  %v79_v25 = vld [vmem:[#allocation2 + $0x68] sm:$0xff]  ;;  %v78_v27 = vld [vmem:[#allocation2 + $0x60] sm:$0xff]  ;;  %v216_v28 = vld [vmem:[#allocation4 + $0x68] sm:$0xff] }
  0x16   :  { %121 = vmatpush.msra.mxu0 %v88_v9  ;;  %239 = vmatpush.msrb.mxu1 %v218_v20  ;;  %v77_v29 = vld [vmem:[#allocation2 + $0x58] sm:$0xff]  ;;  %v231_v30 = vld [vmem:[#allocation4 + $0xe0] sm:$0xff]  ;;  %v75_v31 = vld [vmem:[#allocation2 + $0x48] sm:$0xff] }
  0x17   :  { %162 = vmatpush.msra.mxu2 %v87_v10  ;;  %260 = vmatpush.msrb.mxu3 %v233_v22  ;;  %v76_v32 = vld [vmem:[#allocation2 + $0x50] sm:$0xff]  ;;  %v230_v34 = vld [vmem:[#allocation4 + $0xd8] sm:$0xff]  ;;  %v74_v35 = vld [vmem:[#allocation2 + $0x40] sm:$0xff] }
  0x18   :  { %122 = vmatpush.msra.mxu0 %v86_v11  ;;  %240 = vmatpush.msrb.mxu1 %v217_v24  ;;  %v215_v33 = vld [vmem:[#allocation4 + $0x60] sm:$0xff]  ;;  %v214_v36 = vld [vmem:[#allocation4 + $0x58] sm:$0xff]  ;;  %v73_v37 = vld [vmem:[#allocation2 + $0x38] sm:$0xff] }
  0x19   :  { %163 = vmatpush.msra.mxu2 %v85_v12  ;;  %261 = vmatpush.msrb.mxu3 %v232_v26  ;;  %v229_v38 = vld [vmem:[#allocation4 + $0xd0] sm:$0xff]  ;;  %v72_v39 = vld [vmem:[#allocation2 + $0x30] sm:$0xff]  ;;  %v71_v41 = vld [vmem:[#allocation2 + $0x28] sm:$0xff] }
  0x1a   :  { %123 = vmatpush.msra.mxu0 %v84_v15  ;;  %241 = vmatpush.msrb.mxu1 %v216_v28  ;;  %v213_v40 = vld [vmem:[#allocation4 + $0x50] sm:$0xff]  ;;  %v228_v42 = vld [vmem:[#allocation4 + $0xc8] sm:$0xff]  ;;  %v227_v46 = vld [vmem:[#allocation4 + $0xc0] sm:$0xff] }
  0x1b   :  { %164 = vmatpush.msra.mxu2 %v83_v17  ;;  %262 = vmatpush.msrb.mxu3 %v231_v30  ;;  %v70_v43 = vld [vmem:[#allocation2 + $0x20] sm:$0xff]  ;;  %v212_v44 = vld [vmem:[#allocation4 + $0x48] sm:$0xff]  ;;  %v68_v47 = vld [vmem:[#allocation2 + $0x10] sm:$0xff] }
  0x1c   :  { %124 = vmatpush.msra.mxu0 %v82_v19  ;;  %242 = vmatpush.msrb.mxu1 %v215_v33  ;;  %v69_v45 = vld [vmem:[#allocation2 + $0x18] sm:$0xff]  ;;  %v211_v48 = vld [vmem:[#allocation4 + $0x40] sm:$0xff]  ;;  %v67_v49 = vld [vmem:[#allocation2 + $0x8] sm:$0xff] }
  0x1d   :  { %165 = vmatpush.msra.mxu2 %v81_v21  ;;  %263 = vmatpush.msrb.mxu3 %v230_v34  ;;  %v226_v50 = vld [vmem:[#allocation4 + $0xb8] sm:$0xff]  ;;  %v64_v51 = vld [vmem:[%s570_s0] sm:$0xff]  ;;  %v224_v56 = vld [vmem:[#allocation4 + $0xa8] sm:$0xff] }
  0x1e   :  { %125 = vmatpush.msra.mxu0 %v80_v23  ;;  %243 = vmatpush.msrb.mxu1 %v214_v36  ;;  %v66_v52 = vld [vmem:[#allocation2] sm:$0xff]  ;;  %v210_v53 = vld [vmem:[#allocation4 + $0x38] sm:$0xff]  ;;  %v208_v57 = vld [vmem:[#allocation4 + $0x28] sm:$0xff] }
  0x1f   :  { %166 = vmatpush.msra.mxu2 %v79_v25  ;;  %264 = vmatpush.msrb.mxu3 %v229_v38  ;;  %v225_v54 = vld [vmem:[#allocation4 + $0xb0] sm:$0xff]  ;;  %v223_v58 = vld [vmem:[#allocation4 + $0xa0] sm:$0xff]  ;;  %v222_v60 = vld [vmem:[#allocation4 + $0x98] sm:$0xff] }
  0x20   :  { %126 = vmatpush.msra.mxu0 %v78_v27  ;;  %244 = vmatpush.msrb.mxu1 %v213_v40  ;;  %v209_v55 = vld [vmem:[#allocation4 + $0x30] sm:$0xff]  ;;  %v207_v59 = vld [vmem:[#allocation4 + $0x20] sm:$0xff]  ;;  %v206_v61 = vld [vmem:[#allocation4 + $0x18] sm:$0xff] }
  0x21   :  { %167 = vmatpush.msra.mxu2 %v77_v29  ;;  %265 = vmatpush.msrb.mxu3 %v228_v42  ;;  %v221_v62 = vld [vmem:[#allocation4 + $0x90] sm:$0xff]  ;;  %v220_v0 = vld [vmem:[#allocation4 + $0x88] sm:$0xff]  ;;  %v219_v2 = vld [vmem:[#allocation4 + $0x80] sm:$0xff] }
  0x22   :  { %127 = vmatpush.msra.mxu0 %v76_v32  ;;  %245 = vmatpush.msrb.mxu1 %v212_v44  ;;  %v205_v63 = vld [vmem:[#allocation4 + $0x10] sm:$0xff]  ;;  %v204_v1 = vld [vmem:[#allocation4 + $0x8] sm:$0xff]  ;;  %v203_v3 = vld [vmem:[#allocation4] sm:$0xff] }
  0x23   :  { %168 = vmatpush.msra.mxu2 %v75_v31  ;;  %266 = vmatpush.msrb.mxu3 %v227_v46  ;;  %v297_v4 = vld [vmem:[%s573_s3 + $0x78] sm:$0xff]  ;;  %v296_v5 = vld [vmem:[%s573_s3 + $0x70] sm:$0xff]  ;;  %v295_v6 = vld [vmem:[%s573_s3 + $0x68] sm:$0xff] }
  0x24   :  { %128 = vmatpush.msra.mxu0 %v74_v35  ;;  %246 = vmatpush.msrb.mxu1 %v211_v48  ;;  %v294_v7 = vld [vmem:[%s573_s3 + $0x60] sm:$0xff]  ;;  %v293_v8 = vld [vmem:[%s573_s3 + $0x58] sm:$0xff]  ;;  %v292_v9 = vld [vmem:[%s573_s3 + $0x50] sm:$0xff] }
  0x25   :  { %169 = vmatpush.msra.mxu2 %v73_v37  ;;  %267 = vmatpush.msrb.mxu3 %v226_v50  ;;  %v291_v10 = vld [vmem:[%s573_s3 + $0x48] sm:$0xff]  ;;  %v290_v11 = vld [vmem:[%s573_s3 + $0x40] sm:$0xff]  ;;  %v289_v12 = vld [vmem:[%s573_s3 + $0x38] sm:$0xff] }
  0x26   :  { %129 = vmatpush.msra.mxu0 %v72_v39  ;;  %247 = vmatpush.msrb.mxu1 %v210_v53  ;;  %v100_v13 = vld [vmem:[%s575_s5] sm:$0x3]  ;;  %v288_v15 = vld [vmem:[%s573_s3 + $0x30] sm:$0xff]  ;;  %v287_v16 = vld [vmem:[%s573_s3 + $0x28] sm:$0xff] }
  0x27   :  { %170 = vmatpush.msra.mxu2 %v71_v41  ;;  %268 = vmatpush.msrb.mxu3 %v225_v54  ;;  %v102_v14 = vperm.slane %v100_v13, 0  ;;  %v103_v20 = vperm.slane %v100_v13, 1  ;;  %v286_v30 = vld [vmem:[%s573_s3 + $0x20] sm:$0xff]  ;;  %v285_v31 = vld [vmem:[%s573_s3 + $0x18] sm:$0xff]  ;;  %v284_v32 = vld [vmem:[%s573_s3 + $0x10] sm:$0xff] }
  0x28   :  { %130 = vmatpush.msra.mxu0 %v70_v43  ;;  %248 = vmatpush.msrb.mxu1 %v209_v55  ;;  %v283_v33 = vld [vmem:[%s573_s3 + $0x8] sm:$0xff]  ;;  %v282_v34 = vld [vmem:[%s573_s3] sm:$0xff] }
  0x29   :  { %171 = vmatpush.msra.mxu2 %v69_v45  ;;  %269 = vmatpush.msrb.mxu3 %v224_v56  ;;  %v326_v35 = vld [vmem:[%s574_s4 + $0x8] sm:$0xff]  ;;  %v374_v36 = vld [vmem:[%s576_s6] ss:$0 sm:$0xff] }
  0x2a   :  { %131 = vmatpush.msra.mxu0 %v68_v47  ;;  %249 = vmatpush.msrb.mxu1 %v208_v57  ;;  %v325_v43 = vld [vmem:[%s574_s4] sm:$0xff] }
  0x2b   :  { %172 = vmatpush.msra.mxu2 %v67_v49  ;;  %270 = vmatpush.msrb.mxu3 %v223_v58  ;;  %v375_v44 = vld [vmem:[%s577_s7] ss:$0 sm:$0xff] }
  0x2c   :  { %173 = vmatmul.f32.vlgmr.msra.gmra.mxu2 %v64_v51  ;;  %132 = vmatpush.msra.mxu0 %v66_v52  ;;  %v376_v49 = vld [vmem:[%s578_s8] ss:$0 sm:$0xff] }
  0x2d   :  { %133 = vmatmul.f32.vlgmr.msra.gmra.mxu0 %v64_v51  ;;  %250 = vmatpush.msrb.mxu1 %v207_v59 }
  0x2e   :  { %271 = vmatpush.msrb.mxu3 %v222_v60  ;;  %302 = vmatpush.msrb.mxu0 %v297_v4 }
  0x2f   :  { %251 = vmatpush.msrb.mxu1 %v206_v61  ;;  %349 = vmatpush.msrb.mxu2 %v326_v35 }
  0x30   :  { %272 = vmatpush.msrb.mxu3 %v221_v62  ;;  %303 = vmatpush.msrb.mxu0 %v296_v5 }
  0x31   :  { %252 = vmatpush.msrb.mxu1 %v205_v63  ;;  %350 = vmatpush.msrb.mxu2 %v325_v43 }
  0x32   :  { %273 = vmatpush.msrb.mxu3 %v220_v0  ;;  %304 = vmatpush.msrb.mxu0 %v295_v6 }
  0x33   :  { %253 = vmatpush.msrb.mxu1 %v204_v1 }
  0x34   :  { %274 = vmatpush.msrb.mxu3 %v219_v2  ;;  %305 = vmatpush.msrb.mxu0 %v294_v7 }
  0x35   :  { %254 = vmatpush.msrb.mxu1 %v203_v3 }
  0x36   :  { %306 = vmatpush.msrb.mxu0 %v293_v8 }
  0x38   :  { %307 = vmatpush.msrb.mxu0 %v292_v9 }
  0x3a   :  { %308 = vmatpush.msrb.mxu0 %v291_v10 }
  0x3c   :  { %309 = vmatpush.msrb.mxu0 %v290_v11 }
  0x3e   :  { %310 = vmatpush.msrb.mxu0 %v289_v12 }
  0x40   :  { %311 = vmatpush.msrb.mxu0 %v288_v15 }
  0x42   :  { %312 = vmatpush.msrb.mxu0 %v287_v16 }
  0x44   :  { %313 = vmatpush.msrb.mxu0 %v286_v30 }
  0x46   :  { %314 = vmatpush.msrb.mxu0 %v285_v31 }
  0x48   :  { %315 = vmatpush.msrb.mxu0 %v284_v32 }
  0x4a   :  { %316 = vmatpush.msrb.mxu0 %v283_v33 }
  0x4c   :  { %317 = vmatpush.msrb.mxu0 %v282_v34 }
  0x91   :  { %v154_v18 = vpop.f32.mrf.mxu1 }
  0x95   :  { %v194_v23 = vpop.f32.mrf.mxu3 }
  0xaa   :  { %v134_v17 = vpop.f32.mrf.mxu0 }
  0xab   :  { %v135_v19 = vadd.f32 %v134_v17, %v102_v14 }
  0xad   :  { %v155_v21 = vadd.f32 %v154_v18, %v135_v19 }
  0xaf   :  { %v174_v22 = vpop.f32.mrf.mxu2  ;;  %v199_v24 = vmul.f32 0.2, %v155_v21  ;;  %vm197_vm2 = vcmp.gt.f32.partialorder %v155_v21, 0.0 }
  0xb0   :  { %v175_v25 = vadd.f32 %v174_v22, %v103_v20 }
  0xb1   :  { %v201_v26 = vsel %vm197_vm2, %v155_v21, %v199_v24 }
  0xb2   :  { %v195_v27 = vadd.f32 %v194_v23, %v175_v25  ;;  %255 = vmatmul.f32.vlgmr.msrb.gmra.mxu1 %v201_v26 }
  0xb4   :  { %v200_v28 = vmul.f32 0.2, %v195_v27  ;;  %vm198_vm3 = vcmp.gt.f32.partialorder %v195_v27, 0.0 }
  0xb6   :  { %v202_v29 = vsel %vm198_vm3, %v195_v27, %v200_v28 }
  0xb7   :  { %275 = vmatmul.f32.vlgmr.msrb.gmra.mxu3 %v202_v29 }
 0x12f   :  { %v256_v37 = vpop.f32.mrf.mxu1 }
 0x130   :  { %v257_v38 = vadd.f32 %v374_v36, %v256_v37 }
 0x13a   :  { %v276_v39 = vpop.f32.mrf.mxu3 }
 0x13b   :  { %v277_v40 = vadd.f32 %v276_v39, %v257_v38 }
 0x13d   :  { %v280_v41 = vmul.f32 0.2, %v277_v40  ;;  %vm279_vm4 = vcmp.gt.f32.partialorder %v277_v40, 0.0 }
 0x13f   :  { %v281_v42 = vsel %vm279_vm4, %v277_v40, %v280_v41 }
 0x140   :  { %318 = vmatmul.f32.vlgmr.msrb.gmra.mxu0 %v281_v42 }
 0x1bd   :  { %v319_v45 = vpop.f32.mrf.mxu0 }
 0x1be   :  { %v320_v46 = vadd.f32 %v375_v44, %v319_v45 }
 0x1c0   :  { %vm322_vm5 = vcmp.gt.f32.partialorder %v320_v46, 0.0  ;;  %v323_v47 = vmul.f32 0.2, %v320_v46 }
 0x1c2   :  { %v324_v48 = vsel %vm322_vm5, %v320_v46, %v323_v47 }
 0x1c3   :  { %367 = vmatmul.msk.f32.vlgmr.msrb.gmra.mxu2 %vm331_vm6, %v324_v48 }
 0x246   :  { %v352_v50 = vpop.f32.mrf.mxu2 }
 0x247   :  { %v353_v51 = vadd.f32 %v376_v49, %v352_v50 }
 0x249   :  { %356 = vst.msk [vmem:[%s579_s9] sm:$0xff] %vm355_vm7, %v353_v51 }
 0x24a   :  { %361 = vsyncpa [#allocation3], 1 }
 0x24b   :  { %362 = vsyncpa [#allocation5], 1 }

</bundles_post_ra>
